<compile_context>
chip_gen: v7x
topology: tpu7x:2x2x1
jax: 0.10.0
libtpu: 0.0.40
codegen_flags: <defaults>
</compile_context>

<pallas_src>
import jax
import jax.numpy as jnp
from jax.experimental import pallas as pl
from jax.experimental.pallas import tpu as pltpu


def _neo_kernel(hnu_ref, hnv_ref, w_ref, b_ref, out_ref):
    """One row tile of the NEO score.

    hnu_ref, hnv_ref : [tm, Hp]   (lane-packed) neighborhood embeddings
    w_ref            : [1, Hp]    float32 linear weight, tiled to the packing
    b_ref            : [1]        float32 bias (SMEM)
    out_ref          : [tm, pack] sigmoid(linear(h_N_u * h_N_v)), pack = Hp // H
    """
    # Elementwise product + weight in f32 (VPU; kernel is memory-bound anyway).
    prod = hnu_ref[...].astype(jnp.float32) * hnv_ref[...].astype(jnp.float32)
    weighted = prod * w_ref[...]                               # [tm, Hp] f32

    tm, hp = weighted.shape
    pack = out_ref.shape[-1]                                   # static
    if pack == 1:
        logits = jnp.sum(weighted, axis=-1, keepdims=True)     # [tm, 1]
    else:
        # Segmented lane reduction: Hp = pack * H, one segment per packed row.
        logits = jnp.sum(weighted.reshape(tm, pack, hp // pack), axis=-1)

    logits = logits + b_ref[0]
    out_ref[...] = jax.nn.sigmoid(logits).astype(out_ref.dtype)


def _round_up(x, m):
    return ((x + m - 1) // m) * m


def _choose_tile(m_packed, hp, itemsize,
                 budget_bytes=24 * 1024 * 1024, tm_cap=2048):
    """Largest row tile whose double-buffered inputs fit the VMEM budget."""
    per_row = 2 * 2 * hp * itemsize          # 2 inputs x 2 pipeline buffers
    tm = max(32, min(tm_cap, (budget_bytes // per_row) // 32 * 32))
    m_rounded = _round_up(max(m_packed, 1), 32)
    tm = min(tm, m_rounded)
    # Keep >= 2 grid steps on non-trivial problems so the "parallel" grid axis
    # can be sharded across v7x's two TensorCores.
    if m_rounded > 32 and tm >= m_rounded:
        tm = max(32, _round_up(m_rounded // 2, 32))
    return tm


@jax.jit
def neo_function(h_u, h_v, h_N_u, h_N_v, weight, bias):
    """JAX wrapper matching NEOFunction.forward.

    h_u, h_v : [N, H]  (unused by the reference forward; kept for parity)
    h_N_u    : [N, H]
    h_N_v    : [N, H]
    weight   : [1, H]  (torch Linear weight, shape (out=1, in=H))
    bias     : [1]
    returns  : [N, 1]
    """
    del h_u, h_v  # not used by the reference forward
    N, H = h_N_u.shape
    out_dtype = h_N_u.dtype

    # Lane packing: put 128 // H consecutive rows onto the 128-lane axis.
    pack = 128 // H if (H < 128 and 128 % H == 0) else 1
    hp = H * pack

    # Pad rows so they pack evenly, then view as [M, hp] (free, row-major).
    n_pad = _round_up(N, pack)

    def _pack_rows(x):
        x = jnp.pad(x, ((0, n_pad - N), (0, 0)))
        return x.reshape(n_pad // pack, hp)

    hnu = _pack_rows(h_N_u)
    hnv = _pack_rows(h_N_v)
    m_packed = n_pad // pack

    # Row tile sized to the double-buffered VMEM budget; pad M to a multiple.
    tm = _choose_tile(m_packed, hp, h_N_u.dtype.itemsize)
    m_full = _round_up(m_packed, tm)
    hnu = jnp.pad(hnu, ((0, m_full - m_packed), (0, 0)))
    hnv = jnp.pad(hnv, ((0, m_full - m_packed), (0, 0)))

    w_packed = jnp.tile(weight.reshape(1, H).astype(jnp.float32), (1, pack))
    bias_f32 = bias.reshape(1).astype(jnp.float32)

    grid = (m_full // tm,)
    out_packed = pl.pallas_call(
        _neo_kernel,
        out_shape=jax.ShapeDtypeStruct((m_full, pack), out_dtype),
        grid_spec=pltpu.PrefetchScalarGridSpec(
            num_scalar_prefetch=0,
            grid=grid,
            in_specs=[
                pl.BlockSpec((tm, hp), lambda i: (i, 0)),    # h_N_u row tile
                pl.BlockSpec((tm, hp), lambda i: (i, 0)),    # h_N_v row tile
                pl.BlockSpec((1, hp), lambda i: (0, 0)),     # weight (resident)
                pl.BlockSpec(memory_space=pltpu.MemorySpace.SMEM),  # bias
            ],
            out_specs=pl.BlockSpec((tm, pack), lambda i: (i, 0)),
        ),
        compiler_params=pltpu.CompilerParams(
            dimension_semantics=("parallel",),
            vmem_limit_bytes=32 * 1024 * 1024,
        ),
    )(hnu, hnv, w_packed, bias_f32)

    # Unpack: packed row i, segment j  <->  original row i*pack + j.
    return out_packed.reshape(m_full * pack, 1)[:N]


def _reference(h_N_u, h_N_v, weight, bias):
    overlap = h_N_u * h_N_v
    logits = overlap @ weight.reshape(-1, 1) + bias
    return jax.nn.sigmoid(logits)


if __name__ == "__main__":
    key = jax.random.PRNGKey(0)
    # Small shapes: 10 node pairs (exercises padding + lane packing), hidden=32.
    N, H = 10, 32

    k1, k2, k3, k4, kw, kb = jax.random.split(key, 6)
    h_u = jax.random.normal(k1, (N, H), dtype=jnp.float32)
    h_v = jax.random.normal(k2, (N, H), dtype=jnp.float32)
    h_N_u = jax.random.normal(k3, (N, H), dtype=jnp.float32)
    h_N_v = jax.random.normal(k4, (N, H), dtype=jnp.float32)

    # Deterministic Linear(H, 1) params (mimics torch's uniform(-1/sqrt(H), 1/sqrt(H))).
    bound = 1.0 / (H ** 0.5)
    weight = jax.random.uniform(kw, (1, H), minval=-bound, maxval=bound,
                                dtype=jnp.float32)
    bias = jax.random.uniform(kb, (1,), minval=-bound, maxval=bound,
                              dtype=jnp.float32)

    out = neo_function(h_u, h_v, h_N_u, h_N_v, weight, bias)
    out = jax.block_until_ready(out)

    ref = _reference(h_N_u, h_N_v, weight, bias)
    assert out.shape == (N, 1)
    assert jnp.allclose(out, ref, atol=1e-5, rtol=1e-5)

    print("KERNEL_OK")
</pallas_src>

<mosaic_0001>
module attributes {stable_mosaic.version = 11 : i64} {
  func.func @_neo_kernel(%arg0: i32, %arg1: memref<32x128xf32, #tpu.memory_space<vmem>>, %arg2: memref<32x128xf32, #tpu.memory_space<vmem>>, %arg3: memref<1x128xf32, #tpu.memory_space<vmem>>, %arg4: memref<1xf32, #tpu.memory_space<smem>>, %arg5: memref<32x4xf32, #tpu.memory_space<vmem>>) attributes {dimension_semantics = [#tpu.dimension_semantics<parallel>], iteration_bounds = array<i64: 1>, scalar_prefetch = 0 : i64, scratch_operands = 0 : i64, tpu.core_type = #tpu.core_type<tc>, window_params = [{transform_indices = @transform_0, window_bounds = array<i64: 32, 128>}, {transform_indices = @transform_1, window_bounds = array<i64: 32, 128>}, {pipeline_mode = #tpu.pipeline_mode<synchronous>, transform_indices = @transform_2, window_bounds = array<i64: 1, 128>}, {transform_indices = @transform_3, window_bounds = array<i64: 1>}, {transform_indices = @transform_4, window_bounds = array<i64: 32, 4>}]} {
    %c0 = arith.constant 0 : index
    %c0_0 = arith.constant 0 : index
    %0 = vector.load %arg1[%c0, %c0_0] : memref<32x128xf32, #tpu.memory_space<vmem>>, vector<32x128xf32>
    %c0_1 = arith.constant 0 : index
    %c0_2 = arith.constant 0 : index
    %1 = vector.load %arg2[%c0_1, %c0_2] : memref<32x128xf32, #tpu.memory_space<vmem>>, vector<32x128xf32>
    %2 = arith.mulf %0, %1 : vector<32x128xf32>
    %c0_3 = arith.constant 0 : index
    %c0_4 = arith.constant 0 : index
    %3 = vector.load %arg3[%c0_3, %c0_4] : memref<1x128xf32, #tpu.memory_space<vmem>>, vector<1x128xf32>
    %4 = vector.broadcast %3 : vector<1x128xf32> to vector<32x128xf32>
    %5 = arith.mulf %2, %4 : vector<32x128xf32>
    %6 = vector.shape_cast %5 : vector<32x128xf32> to vector<32x4x32xf32>
    %cst = arith.constant dense<0.000000e+00> : vector<32x4xf32>
    %7 = vector.multi_reduction <add>, %6, %cst [2] : vector<32x4x32xf32> to vector<32x4xf32>
    %c0_5 = arith.constant 0 : index
    %8 = memref.load %arg4[%c0_5] : memref<1xf32, #tpu.memory_space<smem>>
    %9 = vector.broadcast %8 : f32 to vector<32x4xf32>
    %10 = arith.addf %7, %9 : vector<32x4xf32>
    %11 = arith.negf %10 : vector<32x4xf32>
    %12 = math.exp %11 : vector<32x4xf32>
    %cst_6 = arith.constant 1.000000e+00 : f32
    %13 = vector.broadcast %cst_6 : f32 to vector<32x4xf32>
    %14 = arith.addf %13, %12 : vector<32x4xf32>
    %15 = arith.divf %13, %14 : vector<32x4xf32>
    %c0_7 = arith.constant 0 : index
    %c0_8 = arith.constant 0 : index
    %16 = vector.load %arg5[%c0_7, %c0_8] : memref<32x4xf32, #tpu.memory_space<vmem>>, vector<32x4xf32>
    tpu.vector_store %arg5[%c0_7, %c0_8], %15 {strides = array<i32>} : memref<32x4xf32, #tpu.memory_space<vmem>>, vector<32x4xf32>,
    return
  }
  func.func @transform_0(%arg0: i32) -> (i32, i32) {
    %c0_i32 = arith.constant 0 : i32
    %c0_i32_0 = arith.constant 0 : i32
    return %arg0, %c0_i32 : i32, i32
  }
  func.func @transform_1(%arg0: i32) -> (i32, i32) {
    %c0_i32 = arith.constant 0 : i32
    %c0_i32_0 = arith.constant 0 : i32
    return %arg0, %c0_i32 : i32, i32
  }
  func.func @transform_2(%arg0: i32) -> (i32, i32) {
    %c0_i32 = arith.constant 0 : i32
    %c0_i32_0 = arith.constant 0 : i32
    %c0_i32_1 = arith.constant 0 : i32
    return %c0_i32, %c0_i32_0 : i32, i32
  }
  func.func @transform_3(%arg0: i32) -> i32 {
    %c0_i32 = arith.constant 0 : i32
    %c0_i32_0 = arith.constant 0 : i32
    return %c0_i32 : i32
  }
  func.func @transform_4(%arg0: i32) -> (i32, i32) {
    %c0_i32 = arith.constant 0 : i32
    %c0_i32_0 = arith.constant 0 : i32
    return %arg0, %c0_i32 : i32, i32
  }
}

</mosaic_0001>

<bundles_post_ra>
// kernel: neo_function.1
= control target key start
LH: loop header
LB: loop body
LE: loop exit
PB: predicated region body
PF: predicated region fallthrough
CT: control target
= control target key end

     0   :  { %v86_v0 = vlaneseq  ;;  %s1053_s6 = smov 96   ;;  %v1056_v25 = vmov 1983009808   ;;  %v1057_v29 = vmov 1934713408   ;;  %vm353_vm0 = vcmask 257024   ;;  %s1425_s0 = inlined_call_operand.vmem [shape: f32[32,128], index: 0, kind: input, shape index: {}]   ;;  %s1426_s1 = inlined_call_operand.vmem [shape: f32[32,128], index: 1, kind: input, shape index: {}]   ;;  %s1427_s2 = inlined_call_operand.vmem [shape: f32[1,128], index: 2, kind: input, shape index: {}]   ;;  %s1428_s3 = inlined_call_operand.<no memory space> [shape: f32[1], index: 3, kind: input, shape index: {}]   ;;  %s1429_s4 = inlined_call_operand.vmem [shape: f32[32,4], index: 4, kind: output, shape index: {}]  }
   0x1   :  { %v20_v1 = vld [vmem:[%s1425_s0 + $0x10] sm:$0xff]  ;;  %v886_v3 = vld [vmem:[%s1427_s2] ss:$0 sm:$0xff]  ;;  %v21_v7 = vld [vmem:[%s1425_s0 + $0x18] sm:$0xff]  ;;  %v84_v26 = vunpack.c.l.s4 %v1056_v25  ;;  %v116_v30 = vunpack.c.l.s4 %v1057_v29  ;;  %vm838_vm1 = vcmask 1041409   ;;  %vm840_vm2 = vcmask 1042434  }
   0x2   :  { %v24_v2 = vld [vmem:[%s1426_s1 + $0x10] sm:$0xff]  ;;  %v18_v5 = vld [vmem:[%s1425_s0] sm:$0xff]  ;;  %v87_v8 = vshrl.u32 %v86_v0, 7  ;;  %v709_v9 = vand.u32 127, %v86_v0  ;;  %v25_v11 = vld [vmem:[%s1426_s1 + $0x18] sm:$0xff]  ;;  %vm842_vm3 = vcmask 1043459  }
   0x3   :  { %v28_v4 = vmul.f32 %v24_v2, %v20_v1  ;;  %v22_v6 = vld [vmem:[%s1426_s1] sm:$0xff]  ;;  %v19_v12 = vld [vmem:[%s1425_s0 + $0x8] sm:$0xff]  ;;  %v29_v15 = vmul.f32 %v25_v11, %v21_v7  ;;  %s1054_s0 = smov 64   ;;  %v85_v31 = vunpack.c.0.s8 %v84_v26  ;;  %v117_v35 = vunpack.c.0.s8 %v116_v30 }
   0x4   :  { %v26_v10 = vmul.f32 %v22_v6, %v18_v5  ;;  %v23_v13 = vld [vmem:[%s1426_s1 + $0x8] sm:$0xff]  ;;  %v1113_v17 = vsub.s32 %v709_v9, %v87_v8  ;;  %s1055_s1 = smov 32   ;;  %vm844_vm4 = vcmask 1044484   ;;  %vm846_vm5 = vcmask 1045509  }
   0x5   :  { %v1111_v14 = vmul.f32 %v886_v3, %v28_v4  ;;  %v27_v16 = vmul.f32 %v23_v13, %v19_v12  ;;  %v1118_v19 = vmul.f32 %v886_v3, %v29_v15  ;;  %v1144_v36 = vsub.s32 %v85_v31, %v87_v8 }
   0x6   :  { %v1115_v18 = vmul.f32 %v886_v3, %v26_v10  ;;  %v1151_v44 = vsub.s32 %v117_v35, %v87_v8  ;;  %vm848_vm6 = vcmask 1046534   ;;  %vm850_vm7 = vcmask 1047559  }
   0x7   :  { %49 = vrot.lane.b32.xlu1 %v1111_v14, %s1053_s6  ;;  %v1121_v20 = vmul.f32 %v886_v3, %v27_v16  ;;  %vm877_vm8 = vcmask 31744  }
   0x8   :  { %45 = vrot.lane.b32.xlu0 %v1115_v18, %s1053_s6 }
   0xb   :  { %51 = vrot.lane.b32.xlu1 %v1118_v19, %s1053_s6 }
   0xc   :  { %47 = vrot.lane.b32.xlu0 %v1121_v20, %s1053_s6 }
   0xf   :  { %59 = vrot.lane.b32.xlu1 %v1121_v20, %s1054_s0 }
  0x10   :  { %57 = vrot.lane.b32.xlu0 %v1115_v18, %s1054_s0 }
  0x13   :  { %63 = vrot.lane.b32.xlu1 %v1118_v19, %s1054_s0 }
  0x14   :  { %61 = vrot.lane.b32.xlu0 %v1111_v14, %s1054_s0 }
  0x17   :  { %71 = vrot.lane.b32.xlu1 %v1121_v20, %s1055_s1 }
  0x18   :  { %69 = vrot.lane.b32.xlu0 %v1115_v18, %s1055_s1 }
  0x1b   :  { %75 = vrot.lane.b32.xlu1 %v1118_v19, %s1055_s1 }
  0x1c   :  { %73 = vrot.lane.b32.xlu0 %v1111_v14, %s1055_s1 }
  0x79   :  { %v1133_v21 = vpop.permute.xlu1 %49 }
  0x7a   :  { %v1135_v22 = vpop.permute.xlu0 %45 }
  0x7d   :  { %v1137_v23 = vpop.permute.xlu1 %51 }
  0x7e   :  { %v48_v24 = vpop.permute.xlu0 %47 }
  0x81   :  { %v60_v27 = vpop.permute.xlu1 %59 }
  0x82   :  { %v1139_v28 = vpop.permute.xlu0 %57  ;;  %v149_v34 = vcombine.low %v1121_v20, %v60_v27  ;;  %v150_v2 = vcombine.high %v1121_v20, %v60_v27 }
  0x83   :  { %v81_v37 = vcombine.low %v1115_v18, %v1139_v28  ;;  %v82_v16 = vcombine.high %v1115_v18, %v1139_v28 }
  0x84   :  { %v157_v42 = vrot.slane %v149_v34, %v1144_v36  ;;  %v164_v15 = vrot.slane %v150_v2, %v1144_v36 }
  0x85   :  { %v64_v32 = vpop.permute.xlu1 %63  ;;  %v89_v45 = vrot.slane %v81_v37, %v1144_v36  ;;  %v96_v28 = vrot.slane %v82_v16, %v1144_v36 }
  0x86   :  { %v1141_v33 = vpop.permute.xlu0 %61  ;;  %v285_v46 = vcombine.low %v1118_v19, %v64_v32  ;;  %v286_v13 = vcombine.high %v1118_v19, %v64_v32 }
  0x87   :  { %v217_v47 = vcombine.low %v1111_v14, %v1141_v33 }
  0x88   :  { %v293_v56 = vrot.slane %v285_v46, %v1144_v36  ;;  %v300_v18 = vrot.slane %v286_v13, %v1144_v36 }
  0x89   :  { %v72_v38 = vpop.permute.xlu1 %71  ;;  %v225_v57 = vrot.slane %v217_v47, %v1144_v36 }
  0x8a   :  { %v165_v39 = vcombine.low %v48_v24, %v72_v38  ;;  %v70_v40 = vpop.permute.xlu0 %69  ;;  %v166_v60 = vcombine.high %v48_v24, %v72_v38 }
  0x8b   :  { %v97_v41 = vcombine.low %v1135_v22, %v70_v40  ;;  %v98_v3 = vcombine.high %v1135_v22, %v70_v40 }
  0x8c   :  { %v173_v43 = vrot.slane %v165_v39, %v1144_v36  ;;  %v180_v5 = vrot.slane %v166_v60, %v1144_v36 }
  0x8d   :  { %v105_v48 = vrot.slane %v97_v41, %v1144_v36  ;;  %v76_v49 = vpop.permute.xlu1 %75  ;;  %v112_v20 = vrot.slane %v98_v3, %v1144_v36 }
  0x8e   :  { %v301_v50 = vcombine.low %v1137_v23, %v76_v49  ;;  %v74_v51 = vpop.permute.xlu0 %73  ;;  %v181_v54 = vcombine.low %v157_v42, %v173_v43  ;;  %v182_v61 = vcombine.high %v157_v42, %v173_v43  ;;  %v302_v6 = vcombine.high %v1137_v23, %v76_v49 }
  0x8f   :  { %v233_v52 = vcombine.low %v1133_v21, %v74_v51  ;;  %v113_v53 = vcombine.low %v89_v45, %v105_v48  ;;  %v114_v8 = vcombine.high %v89_v45, %v105_v48  ;;  %v234_v23 = vcombine.high %v1133_v21, %v74_v51 }
  0x90   :  { %v309_v55 = vrot.slane %v301_v50, %v1144_v36  ;;  %v1170_v63 = vrot.slane %v181_v54, %v1151_v44  ;;  %v1180_v7 = vrot.slane %v182_v61, %v1151_v44  ;;  %v316_v22 = vrot.slane %v302_v6, %v1144_v36 }
  0x91   :  { %v241_v58 = vrot.slane %v233_v52, %v1144_v36  ;;  %v1165_v59 = vrot.slane %v113_v53, %v1151_v44  ;;  %v128_v25 = vrot.slane %v114_v8, %v1151_v44  ;;  %v197_v27 = vcombine.low %v164_v15, %v180_v5 }
  0x92   :  { %v317_v1 = vcombine.low %v293_v56, %v309_v55  ;;  %v378_v9 = vsel %vm353_vm0, %v1170_v63, 0.0  ;;  %v318_v12 = vcombine.high %v293_v56, %v309_v55  ;;  %v384_v24 = vsel %vm353_vm0, %v1180_v7, 0.0 }
  0x93   :  { %v354_v62 = vsel %vm353_vm0, %v1165_v59, 0.0  ;;  %v249_v0 = vcombine.low %v225_v57, %v241_v58  ;;  %v250_v29 = vcombine.high %v225_v57, %v241_v58  ;;  %v218_v21 = vcombine.high %v1111_v14, %v1141_v33 }
  0x94   :  { %355 = vadd.xlane.f32.xlu0 %v354_v62  ;;  %v1187_v11 = vrot.slane %v317_v1, %v1151_v44  ;;  %v1202_v26 = vrot.slane %v318_v12, %v1151_v44  ;;  %v248_v30 = vrot.slane %v234_v23, %v1144_v36  ;;  %v360_v31 = vsel %vm353_vm0, %v128_v25, 0.0 }
  0x95   :  { %v1175_v4 = vrot.slane %v249_v0, %v1151_v44  ;;  %v333_v32 = vcombine.low %v300_v18, %v316_v22  ;;  %v1213_v35 = vrot.slane %v197_v27, %v1151_v44  ;;  %v264_v37 = vrot.slane %v250_v29, %v1151_v44 }
  0x96   :  { %v426_v19 = vsel %vm353_vm0, %v1187_v11, 0.0  ;;  %v432_v34 = vsel %vm353_vm0, %v1202_v26, 0.0  ;;  %v129_v38 = vcombine.low %v96_v28, %v112_v20  ;;  %v232_v39 = vrot.slane %v218_v21, %v1144_v36 }
  0x97   :  { %v402_v10 = vsel %vm353_vm0, %v1175_v4, 0.0  ;;  %v1218_v14 = vrot.slane %v333_v32, %v1151_v44  ;;  %v198_v33 = vcombine.high %v164_v15, %v180_v5  ;;  %v390_v40 = vsel %vm353_vm0, %v1213_v35, 0.0 }
  0x98   :  { %379 = vadd.xlane.f32.xlu0 %v378_v9  ;;  %403 = vadd.xlane.f32.xlu1 %v402_v10  ;;  %v408_v41 = vsel %vm353_vm0, %v264_v37, 0.0  ;;  %v137_v42 = vrot.slane %v129_v38, %v1151_v44  ;;  %v265_v43 = vcombine.low %v232_v39, %v248_v30  ;;  %v334_v48 = vcombine.high %v300_v18, %v316_v22 }
  0x99   :  { %v438_v45 = vsel %vm353_vm0, %v1218_v14, 0.0  ;;  %v212_v46 = vrot.slane %v198_v33, %v1151_v44  ;;  %v130_v49 = vcombine.high %v96_v28, %v112_v20  ;;  %v266_v54 = vcombine.high %v232_v39, %v248_v30 }
  0x9a   :  { %v366_v36 = vsel %vm353_vm0, %v137_v42, 0.0  ;;  %v273_v47 = vrot.slane %v265_v43, %v1151_v44  ;;  %v348_v52 = vrot.slane %v334_v48, %v1151_v44  ;;  %v1058_v57 = vmov 0.0  }
  0x9b   :  { %v396_v50 = vsel %vm353_vm0, %v212_v46, 0.0  ;;  %v144_v53 = vrot.slane %v130_v49, %v1151_v44  ;;  %v213_v58 = vcombine.high %v1170_v63, %v1058_v57  ;;  %v280_v60 = vrot.slane %v266_v54, %v1151_v44 }
  0x9c   :  { %385 = vadd.xlane.f32.xlu0 %v384_v24  ;;  %427 = vadd.xlane.f32.xlu1 %v426_v19  ;;  %v414_v51 = vsel %vm353_vm0, %v273_v47, 0.0  ;;  %v444_v55 = vsel %vm353_vm0, %v348_v52, 0.0  ;;  %v145_v0 = vcombine.high %v1165_v59, %v1058_v57  ;;  %v281_v1 = vcombine.high %v1175_v4, %v1058_v57 }
  0x9d   :  { %v372_v56 = vsel %vm353_vm0, %v144_v53, 0.0  ;;  %v381_v61 = vsel %vm353_vm0, %v213_v58, 0.0  ;;  %v420_v62 = vsel %vm353_vm0, %v280_v60, 0.0  ;;  %v146_v5 = vcombine.high %v128_v25, %v1058_v57 }
  0x9e   :  { %v357_v2 = vsel %vm353_vm0, %v145_v0, 0.0  ;;  %v405_v3 = vsel %vm353_vm0, %v281_v1, 0.0  ;;  %v349_v63 = vcombine.high %v1187_v11, %v1058_v57  ;;  %v282_v8 = vcombine.high %v264_v37, %v1058_v57 }
  0x9f   :  { %v363_v44 = vsel %vm353_vm0, %v146_v5, 0.0  ;;  %v214_v59 = vcombine.high %v1180_v7, %v1058_v57  ;;  %v147_v10 = vcombine.high %v137_v42, %v1058_v57  ;;  %v350_v12 = vcombine.high %v1202_v26, %v1058_v57 }
  0xa0   :  { %433 = vadd.xlane.f32.xlu0 %v432_v34  ;;  %361 = vadd.xlane.f32.xlu1 %v360_v31  ;;  %v429_v6 = vsel %vm353_vm0, %v349_v63, 0.0  ;;  %v411_v4 = vsel %vm353_vm0, %v282_v8, 0.0  ;;  %v283_v15 = vcombine.high %v273_v47, %v1058_v57  ;;  %v215_v16 = vcombine.high %v1213_v35, %v1058_v57 }
  0xa1   :  { %v387_v9 = vsel %vm353_vm0, %v214_v59, 0.0  ;;  %v369_v11 = vsel %vm353_vm0, %v147_v10, 0.0  ;;  %v435_v13 = vsel %vm353_vm0, %v350_v12, 0.0  ;;  %v148_v22 = vcombine.high %v144_v53, %v1058_v57 }
  0xa2   :  { %v417_v7 = vsel %vm353_vm0, %v283_v15, 0.0  ;;  %v393_v20 = vsel %vm353_vm0, %v215_v16, 0.0  ;;  %v351_v23 = vcombine.high %v1218_v14, %v1058_v57  ;;  %v284_v19 = vcombine.high %v280_v60, %v1058_v57 }
  0xa3   :  { %v375_v24 = vsel %vm353_vm0, %v148_v22, 0.0  ;;  %v216_v26 = vcombine.high %v212_v46, %v1058_v57  ;;  %v352_v18 = vcombine.high %v348_v52, %v1058_v57  ;;  %v1264_v21 = vstv %s1428_s3 }
  0xa4   :  { %391 = vadd.xlane.f32.xlu0 %v390_v40  ;;  %409 = vadd.xlane.f32.xlu1 %v408_v41  ;;  %v441_v25 = vsel %vm353_vm0, %v351_v23, 0.0  ;;  %v423_v27 = vsel %vm353_vm0, %v284_v19, 0.0 }
  0xa5   :  { %v399_v29 = vsel %vm353_vm0, %v216_v26, 0.0  ;;  %v447_v28 = vsel %vm353_vm0, %v352_v18, 0.0 }
  0xa8   :  { %439 = vadd.xlane.f32.xlu0 %v438_v45  ;;  %367 = vadd.xlane.f32.xlu1 %v366_v36 }
  0xac   :  { %397 = vadd.xlane.f32.xlu0 %v396_v50  ;;  %415 = vadd.xlane.f32.xlu1 %v414_v51 }
  0xb0   :  { %445 = vadd.xlane.f32.xlu0 %v444_v55  ;;  %373 = vadd.xlane.f32.xlu1 %v372_v56 }
  0xb4   :  { %382 = vadd.xlane.f32.xlu0 %v381_v61  ;;  %421 = vadd.xlane.f32.xlu1 %v420_v62 }
  0xb8   :  { %358 = vadd.xlane.f32.xlu1 %v357_v2  ;;  %406 = vadd.xlane.f32.xlu0 %v405_v3 }
  0xbc   :  { %364 = vadd.xlane.f32.xlu1 %v363_v44  ;;  %430 = vadd.xlane.f32.xlu0 %v429_v6 }
  0xc0   :  { %412 = vadd.xlane.f32.xlu1 %v411_v4  ;;  %388 = vadd.xlane.f32.xlu0 %v387_v9 }
  0xc4   :  { %370 = vadd.xlane.f32.xlu1 %v369_v11  ;;  %436 = vadd.xlane.f32.xlu0 %v435_v13 }
  0xc8   :  { %418 = vadd.xlane.f32.xlu1 %v417_v7  ;;  %394 = vadd.xlane.f32.xlu0 %v393_v20 }
  0xcc   :  { %376 = vadd.xlane.f32.xlu1 %v375_v24  ;;  %442 = vadd.xlane.f32.xlu0 %v441_v25 }
  0xd0   :  { %424 = vadd.xlane.f32.xlu1 %v423_v27  ;;  %400 = vadd.xlane.f32.xlu0 %v399_v29 }
  0xd4   :  { %448 = vadd.xlane.f32.xlu0 %v447_v28 }
 0x121   :  { %v356_v30 = vpop.xlane.xlu0 %355 }
 0x122   :  { %v452_v31 = vadd.f32 %v1264_v21, %v356_v30 }
 0x124   :  { %v887_v38 = vmul.f32 -1.442695, %v452_v31 }
 0x125   :  { %v404_v32 = vpop.xlane.xlu1 %403  ;;  %v380_v34 = vpop.xlane.xlu0 %379 }
 0x126   :  { %v468_v35 = vadd.f32 %v1264_v21, %v404_v32  ;;  %v460_v37 = vadd.f32 %v1264_v21, %v380_v34  ;;  %925 = vpow2.f32 %v887_v38 }
 0x128   :  { %v903_v33 = vmul.f32 -1.442695, %v468_v35  ;;  %v895_v42 = vmul.f32 -1.442695, %v460_v37 }
 0x129   :  { %v428_v39 = vpop.xlane.xlu1 %427  ;;  %v386_v14 = vpop.xlane.xlu0 %385 }
 0x12a   :  { %v476_v40 = vadd.f32 %v1264_v21, %v428_v39  ;;  %v462_v41 = vadd.f32 %v1264_v21, %v386_v14  ;;  %927 = vpow2.f32 %v903_v33 }
 0x12b   :  { %929 = vpow2.f32 %v895_v42 }
 0x12c   :  { %v911_v43 = vmul.f32 -1.442695, %v476_v40  ;;  %v897_v45 = vmul.f32 -1.442695, %v462_v41 }
 0x12d   :  { %v362_v46 = vpop.xlane.xlu1 %361  ;;  %v434_v36 = vpop.xlane.xlu0 %433 }
 0x12e   :  { %v454_v47 = vadd.f32 %v1264_v21, %v362_v46  ;;  %v478_v48 = vadd.f32 %v1264_v21, %v434_v36  ;;  %931 = vpow2.f32 %v911_v43 }
 0x12f   :  { %933 = vpow2.f32 %v897_v45 }
 0x130   :  { %v889_v49 = vmul.f32 -1.442695, %v454_v47  ;;  %v913_v53 = vmul.f32 -1.442695, %v478_v48  ;;  %v926_v58 = vpop.eup %925 }
 0x131   :  { %v410_v50 = vpop.xlane.xlu1 %409  ;;  %v392_v51 = vpop.xlane.xlu0 %391  ;;  %v580_v1 = vadd.f32 1.0, %v926_v58 }
 0x132   :  { %v470_v52 = vadd.f32 %v1264_v21, %v410_v50  ;;  %v464_v54 = vadd.f32 %v1264_v21, %v392_v51  ;;  %935 = vpow2.f32 %v889_v49 }
 0x133   :  { %937 = vpow2.f32 %v913_v53 }
 0x134   :  { %v905_v55 = vmul.f32 -1.442695, %v470_v52  ;;  %v928_v61 = vpop.eup %927  ;;  %v899_v62 = vmul.f32 -1.442695, %v464_v54 }
 0x135   :  { %v368_v56 = vpop.xlane.xlu1 %367  ;;  %v440_v57 = vpop.xlane.xlu0 %439  ;;  %v596_v6 = vadd.f32 1.0, %v928_v61 }
 0x136   :  { %v456_v60 = vadd.f32 %v1264_v21, %v368_v56  ;;  %v930_v0 = vpop.eup %929  ;;  %939 = vpow2.f32 %v905_v55  ;;  %v480_v8 = vadd.f32 %v1264_v21, %v440_v57 }
 0x137   :  { %v588_v59 = vadd.f32 1.0, %v930_v0  ;;  %941 = vpow2.f32 %v899_v62 }
 0x138   :  { %v932_v5 = vpop.eup %931  ;;  %v891_v63 = vmul.f32 -1.442695, %v456_v60  ;;  %943 = vrcp.f32 %v580_v1  ;;  %v915_v16 = vmul.f32 -1.442695, %v480_v8 }
 0x139   :  { %v416_v2 = vpop.xlane.xlu1 %415  ;;  %v398_v3 = vpop.xlane.xlu0 %397  ;;  %v604_v9 = vadd.f32 1.0, %v932_v5 }
 0x13a   :  { %v934_v44 = vpop.eup %933  ;;  %v472_v4 = vadd.f32 %v1264_v21, %v416_v2  ;;  %945 = vpow2.f32 %v891_v63  ;;  %v466_v7 = vadd.f32 %v1264_v21, %v398_v3 }
 0x13b   :  { %v590_v11 = vadd.f32 1.0, %v934_v44  ;;  %947 = vrcp.f32 %v596_v6 }
 0x13c   :  { %v936_v15 = vpop.eup %935  ;;  %949 = vrcp.f32 %v588_v59  ;;  %v907_v20 = vmul.f32 -1.442695, %v472_v4  ;;  %v901_v29 = vmul.f32 -1.442695, %v466_v7 }
 0x13d   :  { %v374_v10 = vpop.xlane.xlu1 %373  ;;  %v446_v12 = vpop.xlane.xlu0 %445  ;;  %951 = vrcp.f32 %v604_v9  ;;  %v582_v19 = vadd.f32 1.0, %v936_v15 }
 0x13e   :  { %v458_v13 = vadd.f32 %v1264_v21, %v374_v10  ;;  %v938_v22 = vpop.eup %937  ;;  %953 = vrcp.f32 %v590_v11  ;;  %v482_v18 = vadd.f32 %v1264_v21, %v446_v12 }
 0x13f   :  { %955 = vpow2.f32 %v915_v16  ;;  %v606_v28 = vadd.f32 1.0, %v938_v22 }
 0x140   :  { %v893_v23 = vmul.f32 -1.442695, %v458_v13  ;;  %v940_v27 = vpop.eup %939  ;;  %957 = vpow2.f32 %v907_v20  ;;  %v917_v14 = vmul.f32 -1.442695, %v482_v18 }
 0x141   :  { %v422_v24 = vpop.xlane.xlu1 %421  ;;  %v383_v25 = vpop.xlane.xlu0 %382  ;;  %v598_v35 = vadd.f32 1.0, %v940_v27 }
 0x142   :  { %v461_v26 = vadd.f32 %v1264_v21, %v383_v25  ;;  %959 = vpow2.f32 %v893_v23  ;;  %v942_v34 = vpop.eup %941  ;;  %v474_v43 = vadd.f32 %v1264_v21, %v422_v24 }
 0x143   :  { %961 = vrcp.f32 %v582_v19  ;;  %v1284_v39 = vpop.eup %943  ;;  %v592_v42 = vadd.f32 1.0, %v942_v34 }
 0x144   :  { %v896_v30 = vmul.f32 -1.442695, %v461_v26  ;;  %963 = vpow2.f32 %v901_v29  ;;  %v946_v33 = vpop.eup %945  ;;  %v909_v55 = vmul.f32 -1.442695, %v474_v43 }
 0x145   :  { %v359_v31 = vpop.xlane.xlu1 %358  ;;  %v407_v32 = vpop.xlane.xlu0 %406  ;;  %965 = vrcp.f32 %v606_v28  ;;  %v584_v51 = vadd.f32 1.0, %v946_v33 }
 0x146   :  { %v453_v37 = vadd.f32 %v1264_v21, %v359_v31  ;;  %v469_v38 = vadd.f32 %v1264_v21, %v407_v32  ;;  %v1286_v41 = vpop.eup %947  ;;  %967 = vpow2.f32 %v896_v30 }
 0x147   :  { %v1289_v36 = vpop.eup %949  ;;  %969 = vrcp.f32 %v598_v35 }
 0x148   :  { %v888_v40 = vmul.f32 -1.442695, %v453_v37  ;;  %v904_v47 = vmul.f32 -1.442695, %v469_v38  ;;  %v1293_v50 = vpop.eup %951  ;;  %971 = vpow2.f32 %v917_v14 }
 0x149   :  { %v365_v45 = vpop.xlane.xlu1 %364  ;;  %v431_v46 = vpop.xlane.xlu0 %430 }
 0x14a   :  { %v455_v48 = vadd.f32 %v1264_v21, %v365_v45  ;;  %v477_v49 = vadd.f32 %v1264_v21, %v431_v46  ;;  %v1295_v52 = vpop.eup %953  ;;  %973 = vpow2.f32 %v888_v40 }
 0x14b   :  { %v1297_v54 = vpop.eup %955  ;;  %975 = vrcp.f32 %v592_v42 }
 0x14c   :  { %v890_v53 = vmul.f32 -1.442695, %v455_v48  ;;  %v958_v58 = vpop.eup %957  ;;  %977 = vpow2.f32 %v904_v47  ;;  %v912_v60 = vmul.f32 -1.442695, %v477_v49 }
 0x14d   :  { %v413_v56 = vpop.xlane.xlu1 %412  ;;  %v389_v57 = vpop.xlane.xlu0 %388  ;;  %979 = vrcp.f32 %v584_v51  ;;  %v600_v63 = vadd.f32 1.0, %v958_v58 }
 0x14e   :  { %v471_v61 = vadd.f32 %v1264_v21, %v413_v56  ;;  %v463_v62 = vadd.f32 %v1264_v21, %v389_v57  ;;  %v960_v0 = vpop.eup %959  ;;  %981 = vpow2.f32 %v890_v53 }
 0x14f   :  { %v1301_v1 = vpop.eup %961  ;;  %983 = vpow2.f32 %v909_v55  ;;  %v586_v59 = vadd.f32 1.0, %v960_v0 }
 0x150   :  { %v906_v2 = vmul.f32 -1.442695, %v471_v61  ;;  %v898_v3 = vmul.f32 -1.442695, %v463_v62  ;;  %v1303_v5 = vpop.eup %963  ;;  %985 = vpow2.f32 %v912_v60 }
 0x151   :  { %v371_v44 = vpop.xlane.xlu1 %370  ;;  %v437_v6 = vpop.xlane.xlu0 %436 }
 0x152   :  { %v1305_v8 = vpop.eup %965  ;;  %v457_v4 = vadd.f32 %v1264_v21, %v371_v44  ;;  %v479_v9 = vadd.f32 %v1264_v21, %v437_v6  ;;  %987 = vpow2.f32 %v906_v2 }
 0x153   :  { %v968_v10 = vpop.eup %967  ;;  %989 = vpow2.f32 %v898_v3 }
 0x154   :  { %v1309_v12 = vpop.eup %969  ;;  %v892_v11 = vmul.f32 -1.442695, %v457_v4  ;;  %v914_v13 = vmul.f32 -1.442695, %v479_v9  ;;  %991 = vrcp.f32 %v600_v63  ;;  %v589_v16 = vadd.f32 1.0, %v968_v10 }
 0x155   :  { %v1311_v15 = vpop.eup %971  ;;  %v419_v7 = vpop.xlane.xlu1 %418  ;;  %993 = vrcp.f32 %v586_v59 }
 0x156   :  { %v395_v20 = vpop.xlane.xlu0 %394  ;;  %v974_v22 = vpop.eup %973  ;;  %v473_v23 = vadd.f32 %v1264_v21, %v419_v7  ;;  %995 = vpow2.f32 %v892_v11 }
 0x157   :  { %v465_v24 = vadd.f32 %v1264_v21, %v395_v20  ;;  %v1315_v25 = vpop.eup %975  ;;  %v581_v19 = vadd.f32 1.0, %v974_v22  ;;  %997 = vpow2.f32 %v914_v13 }
 0x158   :  { %v978_v26 = vpop.eup %977  ;;  %v908_v27 = vmul.f32 -1.442695, %v473_v23  ;;  %999 = vrcp.f32 %v589_v16  ;;  %v608_v16 = vadd.f32 1.0, %v1297_v54 }
 0x159   :  { %v900_v29 = vmul.f32 -1.442695, %v465_v24  ;;  %v1317_v18 = vpop.eup %979  ;;  %v597_v28 = vadd.f32 1.0, %v978_v26  ;;  %v377_v30 = vpop.xlane.xlu1 %376  ;;  %v713_v24 = vrot.slane %v1284_v39, %v1113_v17  ;;  %v721_v39 = vrot.slane %v1301_v1, %v1113_v17 }
 0x15a   :  { %v443_v31 = vpop.xlane.xlu0 %442  ;;  %v982_v32 = vpop.eup %981  ;;  %1001 = vpow2.f32 %v908_v27  ;;  %v459_v34 = vadd.f32 %v1264_v21, %v377_v30 }
 0x15b   :  { %v481_v35 = vadd.f32 %v1264_v21, %v443_v31  ;;  %v984_v37 = vpop.eup %983  ;;  %1003 = vrcp.f32 %v581_v19  ;;  %v583_v38 = vadd.f32 1.0, %v982_v32  ;;  %v594_v19 = vadd.f32 1.0, %v1303_v5 }
 0x15c   :  { %v986_v14 = vpop.eup %985  ;;  %1005 = vpow2.f32 %v900_v29  ;;  %v894_v33 = vmul.f32 -1.442695, %v459_v34  ;;  %v602_v20 = vadd.f32 1.0, %v984_v37  ;;  %v610_v32 = vadd.f32 1.0, %v1311_v15 }
 0x15d   :  { %v988_v40 = vpop.eup %987  ;;  %1007 = vrcp.f32 %v597_v28  ;;  %v605_v42 = vadd.f32 1.0, %v986_v14  ;;  %v916_v43 = vmul.f32 -1.442695, %v481_v35  ;;  %v425_v45 = vpop.xlane.xlu1 %424  ;;  %v777_v37 = vrot.slane %v1286_v41, %v1113_v17 }
 0x15e   :  { %v401_v46 = vpop.xlane.xlu0 %400  ;;  %v990_v47 = vpop.eup %989  ;;  %v599_v48 = vadd.f32 1.0, %v988_v40  ;;  %1009 = vpow2.f32 %v894_v33  ;;  %v475_v49 = vadd.f32 %v1264_v21, %v425_v45 }
 0x15f   :  { %v467_v51 = vadd.f32 %v1264_v21, %v401_v46  ;;  %v1323_v53 = vpop.eup %991  ;;  %1011 = vrcp.f32 %v583_v38  ;;  %v591_v58 = vadd.f32 1.0, %v990_v47  ;;  %v745_v38 = vrot.slane %v1289_v36, %v1113_v17 }
 0x160   :  { %v1325_v55 = vpop.eup %993  ;;  %1013 = vrcp.f32 %v605_v42  ;;  %v910_v56 = vmul.f32 -1.442695, %v475_v49  ;;  %v809_v47 = vrot.slane %v1293_v50, %v1113_v17 }
 0x161   :  { %v996_v57 = vpop.eup %995  ;;  %1015 = vrcp.f32 %v599_v48  ;;  %v902_v0 = vmul.f32 -1.442695, %v467_v51  ;;  %v785_v48 = vrot.slane %v1309_v12, %v1113_v17 }
 0x162   :  { %v449_v60 = vpop.xlane.xlu0 %448  ;;  %v998_v61 = vpop.eup %997  ;;  %v585_v62 = vadd.f32 1.0, %v996_v57  ;;  %1017 = vpow2.f32 %v916_v43  ;;  %v729_v43 = vrot.slane %v1317_v18, %v1113_v17  ;;  %v753_v18 = vrot.slane %v1295_v52, %v1113_v17 }
 0x163   :  { %v483_v2 = vadd.f32 %v1264_v21, %v449_v60  ;;  %v1328_v3 = vpop.eup %999  ;;  %1019 = vpow2.f32 %v910_v56  ;;  %v607_v59 = vadd.f32 1.0, %v998_v61 }
 0x164   :  { %v1002_v63 = vpop.eup %1001  ;;  %1021 = vrcp.f32 %v585_v62  ;;  %v749_v33 = vrot.slane %v1328_v3, %v1113_v17 }
 0x165   :  { %v918_v44 = vmul.f32 -1.442695, %v483_v2  ;;  %v1004_v6 = vpop.eup %1003  ;;  %1023 = vrcp.f32 %v591_v58  ;;  %v601_v4 = vadd.f32 1.0, %v1002_v63  ;;  %v793_v63 = vrot.slane %v1323_v53, %v1113_v17 }
 0x166   :  { %v1006_v9 = vpop.eup %1005  ;;  %1025 = vpow2.f32 %v902_v0  ;;  %v717_v21 = vrot.slane %v1004_v6, %v1113_v17  ;;  %v852_v60 = vsel %vm838_vm1, %v749_v33, %v745_v38  ;;  %v737_v0 = vrot.slane %v1325_v55, %v1113_v17 }
 0x167   :  { %v1008_v10 = vpop.eup %1007  ;;  %1027 = vrcp.f32 %v601_v4  ;;  %v593_v11 = vadd.f32 1.0, %v1006_v9  ;;  %v817_v9 = vrot.slane %v1305_v8, %v1113_v17  ;;  %v853_v55 = vsel %vm840_vm2, %v753_v18, %v852_v60 }
 0x168   :  { %v1010_v13 = vpop.eup %1009  ;;  %1029 = vpow2.f32 %v918_v44  ;;  %v839_v27 = vsel %vm838_vm1, %v717_v21, %v713_v24  ;;  %v781_v5 = vrot.slane %v1008_v10, %v1113_v17 }
 0x169   :  { %v1012_v7 = vpop.eup %1011  ;;  %1031 = vrcp.f32 %v607_v59  ;;  %v587_v22 = vadd.f32 1.0, %v1010_v13  ;;  %v841_v1 = vsel %vm840_vm2, %v721_v39, %v839_v27 }
 0x16a   :  { %v1332_v23 = vpop.eup %1013  ;;  %1033 = vrcp.f32 %v593_v11  ;;  %v725_v29 = vrot.slane %v1012_v7, %v1113_v17  ;;  %v859_v41 = vsel %vm838_vm1, %v781_v5, %v777_v37 }
 0x16b   :  { %v1016_v26 = vpop.eup %1015  ;;  %1035 = vrcp.f32 %v587_v22  ;;  %v813_v49 = vrot.slane %v1332_v23, %v1113_v17  ;;  %v860_v50 = vsel %vm840_vm2, %v785_v48, %v859_v41 }
 0x16c   :  { %v1018_v54 = vpop.eup %1017  ;;  %1037 = vrcp.f32 %v608_v16  ;;  %v843_v40 = vsel %vm842_vm3, %v725_v29, %v841_v1  ;;  %v789_v36 = vrot.slane %v1016_v26, %v1113_v17 }
 0x16d   :  { %v1020_v28 = vpop.eup %1019  ;;  %1039 = vrcp.f32 %v602_v20  ;;  %v609_v30 = vadd.f32 1.0, %v1018_v54  ;;  %v845_v56 = vsel %vm844_vm4, %v729_v43, %v843_v40  ;;  %v866_v44 = vsel %vm838_vm1, %v813_v49, %v809_v47 }
 0x16e   :  { %v1022_v31 = vpop.eup %1021  ;;  %1041 = vrcp.f32 %v594_v19  ;;  %v603_v34 = vadd.f32 1.0, %v1020_v28  ;;  %v861_v2 = vsel %vm842_vm3, %v789_v36, %v860_v50  ;;  %v761_v20 = vrot.slane %v1315_v25, %v1113_v17 }
 0x16f   :  { %v1024_v35 = vpop.eup %1023  ;;  %1043 = vrcp.f32 %v609_v30  ;;  %v733_v15 = vrot.slane %v1022_v31, %v1113_v17  ;;  %v862_v16 = vsel %vm844_vm4, %v793_v63, %v861_v2  ;;  %v867_v22 = vsel %vm840_vm2, %v817_v9, %v866_v44 }
 0x170   :  { %v1026_v14 = vpop.eup %1025  ;;  %1045 = vrcp.f32 %v603_v34  ;;  %v757_v61 = vrot.slane %v1024_v35, %v1113_v17 }
 0x171   :  { %v1028_v42 = vpop.eup %1027  ;;  %v595_v45 = vadd.f32 1.0, %v1026_v14  ;;  %1047 = vrcp.f32 %v610_v32  ;;  %v847_v12 = vsel %vm846_vm5, %v733_v15, %v845_v56 }
 0x172   :  { %v1030_v46 = vpop.eup %1029  ;;  %v797_v52 = vrot.slane %v1028_v42, %v1113_v17  ;;  %v849_v10 = vsel %vm848_vm6, %v737_v0, %v847_v12  ;;  %v854_v13 = vsel %vm842_vm3, %v757_v61, %v853_v55 }
 0x173   :  { %v1032_v51 = vpop.eup %1031  ;;  %1049 = vrcp.f32 %v595_v45  ;;  %v611_v57 = vadd.f32 1.0, %v1030_v46  ;;  %v855_v25 = vsel %vm844_vm4, %v761_v20, %v854_v13 }
 0x174   :  { %v1034_v58 = vpop.eup %1033  ;;  %v821_v6 = vrot.slane %v1032_v51, %v1113_v17  ;;  %v863_v8 = vsel %vm846_vm5, %v797_v52, %v862_v16 }
 0x175   :  { %v1036_v62 = vpop.eup %1035  ;;  %1051 = vrcp.f32 %v611_v57  ;;  %v765_v53 = vrot.slane %v1034_v58, %v1113_v17 }
 0x176   :  { %v1038_v3 = vpop.eup %1037  ;;  %v741_v59 = vrot.slane %v1036_v62, %v1113_v17  ;;  %v868_v19 = vsel %vm842_vm3, %v821_v6, %v867_v22 }
 0x177   :  { %v1040_v4 = vpop.eup %1039  ;;  %v825_v54 = vrot.slane %v1038_v3, %v1113_v17  ;;  %v856_v28 = vsel %vm846_vm5, %v765_v53, %v855_v25 }
 0x178   :  { %v1042_v11 = vpop.eup %1041  ;;  %v851_v21 = vsel %vm850_vm7, %v741_v59, %v849_v10  ;;  %v801_v24 = vrot.slane %v1040_v4, %v1113_v17 }
 0x179   :  { %v1044_v7 = vpop.eup %1043  ;;  %878 = vst.msk [vmem:[%s1429_s4] sm:$0xff] %vm877_vm8, %v851_v21  ;;  %v769_v30 = vrot.slane %v1042_v11, %v1113_v17  ;;  %v869_v31 = vsel %vm844_vm4, %v825_v54, %v868_v19 }
 0x17a   :  { %v1046_v23 = vpop.eup %1045  ;;  %v829_v26 = vrot.slane %v1044_v7, %v1113_v17  ;;  %v864_v39 = vsel %vm848_vm6, %v801_v24, %v863_v8 }
 0x17b   :  { %v805_v27 = vrot.slane %v1046_v23, %v1113_v17  ;;  %v1048_v29 = vpop.eup %1047  ;;  %v857_v1 = vsel %vm848_vm6, %v769_v30, %v856_v28 }
 0x17c   :  { %v870_v34 = vsel %vm846_vm5, %v829_v26, %v869_v31  ;;  %v833_v38 = vrot.slane %v1048_v29, %v1113_v17 }
 0x17d   :  { %v1050_v5 = vpop.eup %1049  ;;  %v865_v32 = vsel %vm850_vm7, %v805_v27, %v864_v39 }
 0x17e   :  { %880 = vst.msk [vmem:[%s1429_s4 + $0x10] sm:$0xff] %vm877_vm8, %v865_v32  ;;  %v773_v35 = vrot.slane %v1050_v5, %v1113_v17  ;;  %v871_v40 = vsel %vm848_vm6, %v833_v38, %v870_v34 }
 0x17f   :  { %v1052_v37 = vpop.eup %1051 }
 0x180   :  { %v858_v14 = vsel %vm850_vm7, %v773_v35, %v857_v1  ;;  %v837_v33 = vrot.slane %v1052_v37, %v1113_v17 }
 0x181   :  { %879 = vst.msk [vmem:[%s1429_s4 + $0x8] sm:$0xff] %vm877_vm8, %v858_v14 }
 0x182   :  { %v872_v15 = vsel %vm850_vm7, %v837_v33, %v871_v40 }
 0x183   :  { %881 = vst.msk [vmem:[%s1429_s4 + $0x18] sm:$0xff] %vm877_vm8, %v872_v15 }

</bundles_post_ra>
